<compile_context>
chip_gen: v6e
topology: v6e:2x2x1
jax: 0.10.0
libtpu: 0.0.40
codegen_flags: <defaults>
</compile_context>

<pallas_src>
import functools
import math

import jax
import jax.numpy as jnp
from jax.experimental import pallas as pl
from jax.experimental.pallas import tpu as pltpu


# ----------------------------------------------------------------------------
# helpers
# ----------------------------------------------------------------------------
def _activation(name):
    if name == "relu":
        return lambda v: jnp.maximum(v, 0.0)
    if name == "tanh":
        return jnp.tanh
    if name == "sigmoid":
        return jax.nn.sigmoid
    if name in (None, "linear", "none", "identity"):
        return lambda v: v
    raise ValueError(f"unsupported activation: {name}")


def _round_up(d, m=128):
    return ((d + m - 1) // m) * m


def _pad2(a, rows, cols):
    pr, pc = rows - a.shape[0], cols - a.shape[1]
    if pr == 0 and pc == 0:
        return a
    return jnp.pad(a, ((0, pr), (0, pc)))


def _choose_batch_tile(batch):
    """Batch tile: full (8-aligned) batch when small, otherwise >=128-row tiles
    with >=2 grid steps so megacore sharding has work."""
    bp = _round_up(batch, 8)
    if bp <= 128:
        return bp
    if bp <= 512:
        return 128
    return 256


# ----------------------------------------------------------------------------
# one-time parameter preparation (hoisted out of the forward hot path)
# ----------------------------------------------------------------------------
def prepare_encoder_params(params, acts):
    """Fuse the mu/logvar heads, zero-pad every OUTPUT feature dim to a multiple
    of 128 lanes (mathematical no-op: padded weight rows/cols are zero), and cast
    weights to bf16. Biases stay f32.

    params: flat list [W0, b0, ..., W_{L-1}, b_{L-1}, W_mu, b_mu, W_lv, b_lv]
            weights [in, out] (pre-transposed vs. PyTorch), biases [1, out].
    Returns the prepared flat list [W0', b0', ..., W_head', b_head'].
    """
    n = len(acts)
    assert len(params) == 2 * n + 4
    w_mu, b_mu, w_lv, b_lv = params[2 * n:]
    fused = list(params[:2 * n]) + [
        jnp.concatenate([w_mu, w_lv], axis=1),   # [d_mlp, 2*z_dim]
        jnp.concatenate([b_mu, b_lv], axis=1),   # [1,     2*z_dim]
    ]

    d_in = fused[0].shape[0]
    out_dims = [fused[2 * i].shape[1] for i in range(n + 1)]
    pdims = [d_in] + [_round_up(d) for d in out_dims]   # input dim stays unpadded

    prepared = []
    for i in range(n + 1):
        w = _pad2(fused[2 * i], pdims[i], pdims[i + 1]).astype(jnp.bfloat16)
        b = _pad2(fused[2 * i + 1], 1, pdims[i + 1]).astype(jnp.float32)
        prepared.extend([w, b])
    return prepared


# ----------------------------------------------------------------------------
# kernel
# ----------------------------------------------------------------------------
def _encoder_kernel(acts, x_ref, *refs):
    """Fused MLP + fused (mu|logvar) tanh head for one batch tile.

    refs layout: [W0, b0, ..., W_{L-1}, b_{L-1}, W_head, b_head, out]
    Dots run bf16 x bf16 with f32 accumulation; elementwise stays f32.
    """
    n_layers = len(acts)
    n_params = 2 * (n_layers + 1)
    param_refs = refs[:n_params]
    out_ref = refs[n_params]

    h = x_ref[...].astype(jnp.bfloat16)
    for i, act_name in enumerate(acts):
        w = param_refs[2 * i][...]                        # bf16
        b = param_refs[2 * i + 1][...]                    # f32
        y = jnp.dot(h, w, preferred_element_type=jnp.float32) + b
        h = _activation(act_name)(y).astype(jnp.bfloat16)

    w_head = param_refs[n_params - 2][...]                # bf16
    b_head = param_refs[n_params - 1][...]                # f32
    out = jnp.tanh(jnp.dot(h, w_head, preferred_element_type=jnp.float32) + b_head)
    out_ref[...] = out.astype(out_ref.dtype)


# ----------------------------------------------------------------------------
# forward wrapper
# ----------------------------------------------------------------------------
def encoder_forward(x, prepared_params, acts, z_dim, *, batch_tile=None):
    """x: [B, input_dim] f32. prepared_params: output of prepare_encoder_params.
    Returns (mu, logvar), each [B, z_dim] in x.dtype."""
    n_layers = len(acts)
    assert len(prepared_params) == 2 * (n_layers + 1)
    B, d_in = x.shape
    assert prepared_params[0].shape[0] == d_in, "input_dim mismatch with prepared params"
    out_pad = prepared_params[-1].shape[1]
    assert out_pad >= 2 * z_dim

    # --- batch tiling (pad batch rows; rows are independent) -----------------
    tb = batch_tile if batch_tile is not None else _choose_batch_tile(B)
    b_pad = _round_up(B, tb)
    x_p = jnp.pad(x, ((0, b_pad - B), (0, 0))) if b_pad != B else x
    grid = (b_pad // tb,)

    # --- specs ----------------------------------------------------------------
    x_spec = pl.BlockSpec((tb, d_in), lambda i: (i, 0))        # full-extent last dim
    out_spec = pl.BlockSpec((tb, out_pad), lambda i: (i, 0))
    param_specs = [pl.BlockSpec(p.shape, lambda i: (0, 0)) for p in prepared_params]
    out_shape = jax.ShapeDtypeStruct((b_pad, out_pad), x.dtype)

    # --- VMEM budget: never below the estimated need; v7x-safe default cap ---
    param_bytes = sum(int(p.size) * p.dtype.itemsize for p in prepared_params)
    max_feat = max([d_in] + [p.shape[1] for p in prepared_params[::2]])
    act_bytes = tb * max_feat * (4 + 4 + 2)                    # f32 acc + f32 act + bf16 h
    io_bytes = 2 * tb * (d_in + out_pad) * x.dtype.itemsize    # double-buffered x / out
    est = param_bytes + act_bytes + io_bytes
    vmem_limit = int(min(max(2 * est, 16 << 20), 48 << 20))    # fits every generation
    if est + (2 << 20) > vmem_limit:                           # big model: use v5e/v6e headroom
        vmem_limit = int(min(est + (8 << 20), 96 << 20))

    kernel = functools.partial(_encoder_kernel, tuple(acts))
    out = pl.pallas_call(
        kernel,
        out_shape=out_shape,
        grid_spec=pltpu.PrefetchScalarGridSpec(
            num_scalar_prefetch=0,
            grid=grid,
            in_specs=[x_spec] + param_specs,
            out_specs=out_spec,
        ),
        compiler_params=pltpu.CompilerParams(
            dimension_semantics=("parallel",),
            vmem_limit_bytes=vmem_limit,
        ),
    )(x_p, *prepared_params)

    mu = out[:B, :z_dim]
    logvar = out[:B, z_dim:2 * z_dim]
    return mu, logvar


# ----------------------------------------------------------------------------
# param init + pure-JAX reference
# ----------------------------------------------------------------------------
def init_encoder_params(key, input_dim, seq, z_dim):
    """Parameters matching the module's __init__ shapes (f32, weights [in, out])."""
    params = []
    dims = [input_dim] + [h for (h, _) in seq]
    keys = jax.random.split(key, len(seq) + 2)
    for li, (di, do) in enumerate(zip(dims[:-1], dims[1:])):
        kw, kb = jax.random.split(keys[li])
        s = 1.0 / math.sqrt(di)
        params.append(jax.random.uniform(kw, (di, do), jnp.float32, -s, s))
        params.append(jax.random.uniform(kb, (1, do), jnp.float32, -s, s))
    d_mlp = dims[-1]
    for hk in keys[len(seq):]:  # mu head, logvar head
        kw, kb = jax.random.split(hk)
        s = 1.0 / math.sqrt(d_mlp)
        params.append(jax.random.uniform(kw, (d_mlp, z_dim), jnp.float32, -s, s))
        params.append(jax.random.uniform(kb, (1, z_dim), jnp.float32, -s, s))
    return params


def encoder_reference(x, params, acts):
    """Pure-JAX reference with the same bf16-dot / f32-accumulate numerics."""
    n = len(acts)
    h = x.astype(jnp.bfloat16)
    for i, a in enumerate(acts):
        y = jnp.dot(h, params[2 * i].astype(jnp.bfloat16),
                    preferred_element_type=jnp.float32) + params[2 * i + 1]
        h = _activation(a)(y).astype(jnp.bfloat16)

    def head(w, b):
        return jnp.tanh(jnp.dot(h, w.astype(jnp.bfloat16),
                                preferred_element_type=jnp.float32) + b)

    return head(params[2 * n], params[2 * n + 1]), head(params[2 * n + 2], params[2 * n + 3])


# ----------------------------------------------------------------------------
# demo / self-test
# ----------------------------------------------------------------------------
if __name__ == "__main__":
    batch = 8
    input_dim = 32
    seq = [[64, "relu"], [32, "relu"]]   # [(h_i, act_i), ...]
    z_dim = 16
    acts = [a for (_, a) in seq]

    key = jax.random.PRNGKey(0)
    k_x, k_p = jax.random.split(key)
    x = jax.random.normal(k_x, (batch, input_dim), jnp.float32)
    params = init_encoder_params(k_p, input_dim, seq, z_dim)

    # One-time prep (head fusion, 128-lane padding, bf16 weights) — not in the hot path.
    prepared = prepare_encoder_params(params, acts)

    mu, logvar = encoder_forward(x, prepared, acts, z_dim)
    mu = jax.block_until_ready(mu)
    logvar = jax.block_until_ready(logvar)

    mu_ref, lv_ref = encoder_reference(x, params, acts)
    assert mu.shape == (batch, z_dim) and logvar.shape == (batch, z_dim)
    assert jnp.allclose(mu, mu_ref, atol=5e-3, rtol=5e-3), "mu mismatch"
    assert jnp.allclose(logvar, lv_ref, atol=5e-3, rtol=5e-3), "logvar mismatch"

    print("KERNEL_OK")
</pallas_src>

<mosaic_0001>
module attributes {stable_mosaic.version = 11 : i64} {
  func.func @_encoder_kernel(%arg0: i32, %arg1: memref<8x32xf32, #tpu.memory_space<vmem>>, %arg2: memref<32x128xbf16, #tpu.memory_space<vmem>>, %arg3: memref<1x128xf32, #tpu.memory_space<vmem>>, %arg4: memref<128x128xbf16, #tpu.memory_space<vmem>>, %arg5: memref<1x128xf32, #tpu.memory_space<vmem>>, %arg6: memref<128x128xbf16, #tpu.memory_space<vmem>>, %arg7: memref<1x128xf32, #tpu.memory_space<vmem>>, %arg8: memref<8x128xf32, #tpu.memory_space<vmem>>) attributes {dimension_semantics = [#tpu.dimension_semantics<parallel>], iteration_bounds = array<i64: 1>, scalar_prefetch = 0 : i64, scratch_operands = 0 : i64, tpu.core_type = #tpu.core_type<tc>, window_params = [{transform_indices = @transform_0, window_bounds = array<i64: 8, 32>}, {pipeline_mode = #tpu.pipeline_mode<synchronous>, transform_indices = @transform_1, window_bounds = array<i64: 32, 128>}, {pipeline_mode = #tpu.pipeline_mode<synchronous>, transform_indices = @transform_2, window_bounds = array<i64: 1, 128>}, {pipeline_mode = #tpu.pipeline_mode<synchronous>, transform_indices = @transform_3, window_bounds = array<i64: 128, 128>}, {pipeline_mode = #tpu.pipeline_mode<synchronous>, transform_indices = @transform_4, window_bounds = array<i64: 1, 128>}, {pipeline_mode = #tpu.pipeline_mode<synchronous>, transform_indices = @transform_5, window_bounds = array<i64: 128, 128>}, {pipeline_mode = #tpu.pipeline_mode<synchronous>, transform_indices = @transform_6, window_bounds = array<i64: 1, 128>}, {transform_indices = @transform_7, window_bounds = array<i64: 8, 128>}]} {
    %c0 = arith.constant 0 : index
    %c0_0 = arith.constant 0 : index
    %0 = vector.load %arg1[%c0, %c0_0] : memref<8x32xf32, #tpu.memory_space<vmem>>, vector<8x32xf32>
    %1 = arith.truncf %0 : vector<8x32xf32> to vector<8x32xbf16>
    %c0_1 = arith.constant 0 : index
    %c0_2 = arith.constant 0 : index
    %2 = vector.load %arg2[%c0_1, %c0_2] : memref<32x128xbf16, #tpu.memory_space<vmem>>, vector<32x128xbf16>
    %c0_3 = arith.constant 0 : index
    %c0_4 = arith.constant 0 : index
    %3 = vector.load %arg3[%c0_3, %c0_4] : memref<1x128xf32, #tpu.memory_space<vmem>>, vector<1x128xf32>
    %cst = arith.constant dense<0.000000e+00> : vector<8x128xf32>
    %4 = tpu.matmul %1, %2, %cst {dimension_numbers = #tpu.dot_dimension_numbers<[1], [0], [0], [1], [0, 0, 1, 1], [], []>} : vector<8x32xbf16>, vector<32x128xbf16>, vector<8x128xf32> -> vector<8x128xf32>
    %5 = vector.broadcast %3 : vector<1x128xf32> to vector<8x128xf32>
    %6 = arith.addf %4, %5 : vector<8x128xf32>
    %cst_5 = arith.constant 0.000000e+00 : f32
    %7 = vector.broadcast %cst_5 : f32 to vector<8x128xf32>
    %8 = arith.maximumf %6, %7 : vector<8x128xf32>
    %9 = arith.truncf %8 : vector<8x128xf32> to vector<8x128xbf16>
    %c0_6 = arith.constant 0 : index
    %c0_7 = arith.constant 0 : index
    %10 = vector.load %arg4[%c0_6, %c0_7] : memref<128x128xbf16, #tpu.memory_space<vmem>>, vector<128x128xbf16>
    %c0_8 = arith.constant 0 : index
    %c0_9 = arith.constant 0 : index
    %11 = vector.load %arg5[%c0_8, %c0_9] : memref<1x128xf32, #tpu.memory_space<vmem>>, vector<1x128xf32>
    %cst_10 = arith.constant dense<0.000000e+00> : vector<8x128xf32>
    %12 = tpu.matmul %9, %10, %cst_10 {dimension_numbers = #tpu.dot_dimension_numbers<[1], [0], [0], [1], [0, 0, 1, 1], [], []>} : vector<8x128xbf16>, vector<128x128xbf16>, vector<8x128xf32> -> vector<8x128xf32>
    %13 = vector.broadcast %11 : vector<1x128xf32> to vector<8x128xf32>
    %14 = arith.addf %12, %13 : vector<8x128xf32>
    %cst_11 = arith.constant 0.000000e+00 : f32
    %15 = vector.broadcast %cst_11 : f32 to vector<8x128xf32>
    %16 = arith.maximumf %14, %15 : vector<8x128xf32>
    %17 = arith.truncf %16 : vector<8x128xf32> to vector<8x128xbf16>
    %c0_12 = arith.constant 0 : index
    %c0_13 = arith.constant 0 : index
    %18 = vector.load %arg6[%c0_12, %c0_13] : memref<128x128xbf16, #tpu.memory_space<vmem>>, vector<128x128xbf16>
    %c0_14 = arith.constant 0 : index
    %c0_15 = arith.constant 0 : index
    %19 = vector.load %arg7[%c0_14, %c0_15] : memref<1x128xf32, #tpu.memory_space<vmem>>, vector<1x128xf32>
    %cst_16 = arith.constant dense<0.000000e+00> : vector<8x128xf32>
    %20 = tpu.matmul %17, %18, %cst_16 {dimension_numbers = #tpu.dot_dimension_numbers<[1], [0], [0], [1], [0, 0, 1, 1], [], []>} : vector<8x128xbf16>, vector<128x128xbf16>, vector<8x128xf32> -> vector<8x128xf32>
    %21 = vector.broadcast %19 : vector<1x128xf32> to vector<8x128xf32>
    %22 = arith.addf %20, %21 : vector<8x128xf32>
    %23 = math.tanh %22 : vector<8x128xf32>
    %c0_17 = arith.constant 0 : index
    %c0_18 = arith.constant 0 : index
    %24 = vector.load %arg8[%c0_17, %c0_18] : memref<8x128xf32, #tpu.memory_space<vmem>>, vector<8x128xf32>
    tpu.vector_store %arg8[%c0_17, %c0_18], %23 {strides = array<i32>} : memref<8x128xf32, #tpu.memory_space<vmem>>, vector<8x128xf32>,
    return
  }
  func.func @transform_0(%arg0: i32) -> (i32, i32) {
    %c0_i32 = arith.constant 0 : i32
    %c0_i32_0 = arith.constant 0 : i32
    return %arg0, %c0_i32 : i32, i32
  }
  func.func @transform_1(%arg0: i32) -> (i32, i32) {
    %c0_i32 = arith.constant 0 : i32
    %c0_i32_0 = arith.constant 0 : i32
    %c0_i32_1 = arith.constant 0 : i32
    return %c0_i32, %c0_i32_0 : i32, i32
  }
  func.func @transform_2(%arg0: i32) -> (i32, i32) {
    %c0_i32 = arith.constant 0 : i32
    %c0_i32_0 = arith.constant 0 : i32
    %c0_i32_1 = arith.constant 0 : i32
    return %c0_i32, %c0_i32_0 : i32, i32
  }
  func.func @transform_3(%arg0: i32) -> (i32, i32) {
    %c0_i32 = arith.constant 0 : i32
    %c0_i32_0 = arith.constant 0 : i32
    %c0_i32_1 = arith.constant 0 : i32
    return %c0_i32, %c0_i32_0 : i32, i32
  }
  func.func @transform_4(%arg0: i32) -> (i32, i32) {
    %c0_i32 = arith.constant 0 : i32
    %c0_i32_0 = arith.constant 0 : i32
    %c0_i32_1 = arith.constant 0 : i32
    return %c0_i32, %c0_i32_0 : i32, i32
  }
  func.func @transform_5(%arg0: i32) -> (i32, i32) {
    %c0_i32 = arith.constant 0 : i32
    %c0_i32_0 = arith.constant 0 : i32
    %c0_i32_1 = arith.constant 0 : i32
    return %c0_i32, %c0_i32_0 : i32, i32
  }
  func.func @transform_6(%arg0: i32) -> (i32, i32) {
    %c0_i32 = arith.constant 0 : i32
    %c0_i32_0 = arith.constant 0 : i32
    %c0_i32_1 = arith.constant 0 : i32
    return %c0_i32, %c0_i32_0 : i32, i32
  }
  func.func @transform_7(%arg0: i32) -> (i32, i32) {
    %c0_i32 = arith.constant 0 : i32
    %c0_i32_0 = arith.constant 0 : i32
    return %arg0, %c0_i32 : i32, i32
  }
}

</mosaic_0001>

<bundles_post_ra>
// kernel: tpu_custom_call.1
= control target key start
LH: loop header
LB: loop body
LE: loop exit
PB: predicated region body
PF: predicated region fallthrough
CT: control target
= control target key end

     0   :  { %12 = vsyncpa [#allocation3], 0  ;;  %s729_s0 = inlined_call_operand.hbm [shape: f32[8,32], index: 0, kind: input, shape index: {}]   ;;  %s730_s1 = inlined_call_operand.hbm [shape: bf16[32,128], index: 1, kind: input, shape index: {}]   ;;  %s731_s2 = inlined_call_operand.vmem [shape: f32[1,128], index: 2, kind: input, shape index: {}]   ;;  %s732_s3 = inlined_call_operand.hbm [shape: bf16[128,128], index: 3, kind: input, shape index: {}]   ;;  %s733_s4 = inlined_call_operand.vmem [shape: f32[1,128], index: 4, kind: input, shape index: {}]   ;;  %s734_s5 = inlined_call_operand.hbm [shape: bf16[128,128], index: 5, kind: input, shape index: {}]   ;;  %s735_s6 = inlined_call_operand.vmem [shape: f32[1,128], index: 6, kind: input, shape index: {}]   ;;  %s736_s7 = inlined_call_operand.hbm [shape: f32[8,128], index: 7, kind: output, shape index: {}]  }
   0x1   :  { %13 = vsyncpa [#allocation6], 0 }
   0x2   :  { %14 = vsyncpa [#allocation9], 0 }
   0x3   :  { %15 = vsyncpa [#allocation4], 0  ;;  %s623_s24 = smov [#allocation5]  }
   0x4   :  { %s31_s25 = sshll.u32 %s623_s24, 4  ;;  %s32_s25 = int_to_ptr.vmem [resolvable:$true] %s31_s25 }
   0x5   :  { %s523_s26 = scalar_lea.vmem %s32_s25, 256  ;;  %p528_p1 = scmp.lt.s32.totalorder %s32_s25, %s32_s25 }
   0x6   :  { %p524_p0 = scmp.ne.s32.totalorder %s32_s25, %s523_s26  ;;  %p529_p2 = scmp.lt.s32.totalorder %s523_s26, %s523_s26 }
   0x8   :  { %p530_p3 = por %p529_p2, %p528_p1 }
   0xa   :  { %p531_p4 = pnand %p530_p3, %p524_p0 }
   0xc   :  { %534 = shalt.err (!%p531_p4)
}
   0xd   :  { %s624_s27 = smov 64   ;;  %s625_s28 = smov 4  }
   0xe   :  { %37 = dma.hbm_to_vmem [thread:$0]  %s730_s1, 256, %s32_s25, [#allocation6], %s624_s27, %s624_s27, %s625_s28  }
   0xf   :  { %s626_s8 = smov [#allocation2]   ;;  %s627_s10 = smov [#allocation7]  }
  0x10   :  { %s22_s9 = sshll.u32 %s626_s8, 4  ;;  %s45_s11 = sshll.u32 %s627_s10, 4  ;;  %s23_s9 = int_to_ptr.vmem [resolvable:$true] %s22_s9  ;;  %s46_s11 = int_to_ptr.vmem [resolvable:$true] %s45_s11 }
  0x11   :  { %s543_s12 = scalar_lea.vmem %s23_s9, 128  ;;  %p548_p6 = scmp.lt.s32.totalorder %s23_s9, %s23_s9 }
  0x12   :  { %p544_p5 = scmp.ne.s32.totalorder %s23_s9, %s543_s12  ;;  %p549_p7 = scmp.lt.s32.totalorder %s543_s12, %s543_s12 }
  0x14   :  { %p550_p8 = por %p549_p7, %p548_p6 }
  0x16   :  { %p551_p9 = pnand %p550_p8, %p544_p5 }
  0x18   :  { %554 = shalt.err (!%p551_p9)
}
  0x19   :  { %25 = dma.hbm_to_vmem [thread:$0]  %s729_s0, 128, %s23_s9, [#allocation3]  }
  0x1a   :  { %s563_s15 = scalar_lea.vmem %s46_s11, 1024  ;;  %p568_p11 = scmp.lt.s32.totalorder %s46_s11, %s46_s11 }
  0x1b   :  { %p564_p10 = scmp.ne.s32.totalorder %s46_s11, %s563_s15  ;;  %p569_p12 = scmp.lt.s32.totalorder %s563_s15, %s563_s15 }
  0x1d   :  { %p570_p13 = por %p569_p12, %p568_p11 }
  0x1f   :  { %p571_p0 = pnand %p570_p13, %p564_p10 }
  0x21   :  { %574 = shalt.err (!%p571_p0)
}
  0x22   :  { %51 = dma.hbm_to_vmem [thread:$0]  %s732_s3, 1024, %s46_s11, [#allocation6], %s624_s27, %s624_s27, %s625_s28  }
  0x23   :  { %s628_s17 = smov [#allocation8]  }
  0x24   :  { %s59_s18 = sshll.u32 %s628_s17, 4  ;;  %s60_s18 = int_to_ptr.vmem [resolvable:$true] %s59_s18 }
  0x25   :  { %s583_s19 = scalar_lea.vmem %s60_s18, 1024  ;;  %p588_p2 = scmp.lt.s32.totalorder %s60_s18, %s60_s18 }
  0x26   :  { %p584_p1 = scmp.ne.s32.totalorder %s60_s18, %s583_s19  ;;  %p589_p3 = scmp.lt.s32.totalorder %s583_s19, %s583_s19 }
  0x28   :  { %p590_p4 = por %p589_p3, %p588_p2 }
  0x2a   :  { %p591_p5 = pnand %p590_p4, %p584_p1 }
  0x2c   :  { %594 = shalt.err (!%p591_p5)
}
  0x2d   :  { %65 = dma.hbm_to_vmem [thread:$0]  %s734_s5, 1024, %s60_s18, [#allocation9], %s624_s27, %s624_s27, %s625_s28  }
  0x2e   :  { %615 = dma.done.wait [#allocation3], 128  }
  0x2f   :  { %616 = vsyncadd [#allocation3], 4294967168 }
  0x30   :  { %617 = dma.done.wait [#allocation6], 1280  }
  0x31   :  { %618 = vsyncadd [#allocation6], 4294966016 }
  0x32   :  { %619 = dma.done.wait [#allocation9], 1024  }
  0x33   :  { %620 = vsyncadd [#allocation9], 4294966272  ;;  %v629_v0 = vmov 0.0   ;;  %vm630_vm0 = vmmov 0   ;;  %v495_v1 = vld [vmem:[#allocation5 + $0x8] sm:$0xff]   ;;  %v496_v2 = vld [vmem:[#allocation5] sm:$0xff]  }
  0x34   :  { %438 = vmatprep.subr.bf16.mxu0 %v629_v0  ;;  %442 = vmatprep.mubr.msk.bf16.mxu0 %vm630_vm0, %v629_v0  ;;  %v81_v3 = vld [vmem:[#allocation2] sm:$0xff]  ;;  %v497_v4 = vld [vmem:[#allocation7 + $0x38] sm:$0xff]   ;;  %v498_v6 = vld [vmem:[#allocation7 + $0x30] sm:$0xff]   ;;  %vm106_vm1 = vcmask 261120   ;;  %s631_s24 = smov [#allocation10]  }
  0x35   :  { %446 = vmatprep.subr.bf16.mxu1 %v629_v0  ;;  %462 = vmatprep.mubr.msk.bf16.mxu1 %vm630_vm0, %v629_v0  ;;  %v82_v5 = vpack.c.bf16 %v81_v3, %v81_v3  ;;  %v499_v7 = vld [vmem:[#allocation7 + $0x28] sm:$0xff]   ;;  %v500_v8 = vld [vmem:[#allocation7 + $0x20] sm:$0xff]   ;;  %v501_v9 = vld [vmem:[#allocation7 + $0x18] sm:$0xff]  }
  0x36   :  { %439 = vmatpush3.bf16.msra.mxu0 %v495_v1  ;;  %447 = vmatpush3.bf16.msra.mxu1 %v497_v4  ;;  %v502_v10 = vld [vmem:[#allocation7 + $0x10] sm:$0xff]   ;;  %v503_v11 = vld [vmem:[#allocation7 + $0x8] sm:$0xff]   ;;  %v504_v12 = vld [vmem:[#allocation7] sm:$0xff]  }
  0x37   :  { %440 = vmatprep.subr.bf16.mxu0 %v629_v0  ;;  %448 = vmatprep.subr.bf16.mxu1 %v629_v0  ;;  %v505_v13 = vld [vmem:[#allocation8 + $0x38] sm:$0xff]   ;;  %v506_v14 = vld [vmem:[#allocation8 + $0x30] sm:$0xff]   ;;  %v507_v15 = vld [vmem:[#allocation8 + $0x28] sm:$0xff]  }
  0x38   :  { %v508_v16 = vld [vmem:[#allocation8 + $0x20] sm:$0xff]   ;;  %v509_v17 = vld [vmem:[#allocation8 + $0x18] sm:$0xff]   ;;  %v510_v18 = vld [vmem:[#allocation8 + $0x10] sm:$0xff]  }
  0x39   :  { %v395_v19 = vld [vmem:[%s731_s2] ss:$0 sm:$0xff]  ;;  %v512_v28 = vld [vmem:[#allocation8] sm:$0xff]  }
  0x3a   :  { %441 = vmatpush3.bf16.msra.mxu0 %v496_v2  ;;  %449 = vmatpush3.bf16.msra.mxu1 %v498_v6  ;;  %v511_v27 = vld [vmem:[#allocation8 + $0x8] sm:$0xff]  }
  0x3b   :  { %466 = vmatprep.subr.bf16.mxu0 %v629_v0  ;;  %450 = vmatprep.subr.bf16.mxu1 %v629_v0  ;;  %v399_v29 = vld [vmem:[%s733_s4] ss:$0 sm:$0xff]  ;;  %s384_s4 = sshll.u32 %s631_s24, 4  ;;  %s385_s4 = int_to_ptr.vmem [resolvable:$true] %s384_s4 }
  0x3c   :  { %v408_v37 = vld [vmem:[%s735_s6] ss:$0 sm:$0xff]  ;;  %s595_s25 = scalar_lea.vmem %s385_s4, 128  ;;  %p600_p7 = scmp.lt.s32.totalorder %s385_s4, %s385_s4 }
  0x3d   :  { %443 = vmatmul.mubr.msk.bf16.vlgmr.msra.gmra.mxu0 %vm106_vm1, %v82_v5  ;;  %p596_p6 = scmp.ne.s32.totalorder %s385_s4, %s595_s25  ;;  %p601_p8 = scmp.lt.s32.totalorder %s595_s25, %s595_s25 }
  0x3e   :  { %482 = vmatprep.mubr.msk.bf16.mxu0 %vm630_vm0, %v629_v0  ;;  %451 = vmatpush3.bf16.msra.mxu1 %v499_v7 }
  0x3f   :  { %452 = vmatprep.subr.bf16.mxu1 %v629_v0  ;;  %467 = vmatpush3.bf16.msra.mxu0 %v505_v13  ;;  %p602_p9 = por %p601_p8, %p600_p7 }
  0x40   :  { %468 = vmatprep.subr.bf16.mxu0 %v629_v0 }
  0x41   :  { %p603_p10 = pnand %p602_p9, %p596_p6 }
  0x42   :  { %453 = vmatpush3.bf16.msra.mxu1 %v500_v8 }
  0x43   :  { %454 = vmatprep.subr.bf16.mxu1 %v629_v0  ;;  %469 = vmatpush3.bf16.msra.mxu0 %v506_v14 }
  0x44   :  { %470 = vmatprep.subr.bf16.mxu0 %v629_v0 }
  0x46   :  { %455 = vmatpush3.bf16.msra.mxu1 %v501_v9 }
  0x47   :  { %456 = vmatprep.subr.bf16.mxu1 %v629_v0  ;;  %471 = vmatpush3.bf16.msra.mxu0 %v507_v15 }
  0x48   :  { %472 = vmatprep.subr.bf16.mxu0 %v629_v0 }
  0x4a   :  { %457 = vmatpush3.bf16.msra.mxu1 %v502_v10 }
  0x4b   :  { %458 = vmatprep.subr.bf16.mxu1 %v629_v0  ;;  %473 = vmatpush3.bf16.msra.mxu0 %v508_v16 }
  0x4c   :  { %474 = vmatprep.subr.bf16.mxu0 %v629_v0 }
  0x4e   :  { %459 = vmatpush3.bf16.msra.mxu1 %v503_v11 }
  0x4f   :  { %460 = vmatprep.subr.bf16.mxu1 %v629_v0  ;;  %475 = vmatpush3.bf16.msra.mxu0 %v509_v17 }
  0x50   :  { %476 = vmatprep.subr.bf16.mxu0 %v629_v0 }
  0x52   :  { %461 = vmatpush3.bf16.msra.mxu1 %v504_v12 }
  0x53   :  { %477 = vmatpush3.bf16.msra.mxu0 %v510_v18 }
  0x54   :  { %478 = vmatprep.subr.bf16.mxu0 %v629_v0 }
  0x57   :  { %479 = vmatpush3.bf16.msra.mxu0 %v511_v27 }
  0x58   :  { %480 = vmatprep.subr.bf16.mxu0 %v629_v0 }
  0x5b   :  { %481 = vmatpush3.bf16.msra.mxu0 %v512_v28 }
  0xfd   :  { %v144_v20 = vpop.f32.mrf.mxu0 }
  0xfe   :  { %v145_v21 = vadd.f32 %v395_v19, %v144_v20 }
  0xff   :  { %v444_v22 = vpop.f32.mrf.mxu0 }
 0x100   :  { %v150_v23 = vmax.f32 %v145_v21, 0.0 }
 0x101   :  { %v147_v24 = vpop.f32.mrf.mxu0 }
 0x102   :  { %v151_v25 = vpack.c.bf16 %v150_v23, %v150_v23 }
 0x103   :  { %v445_v26 = vpop.f32.mrf.mxu0 }
 0x104   :  { %463 = vmatmul.mubr.bf16.vlgmr.msra.gmra.mxu1 %v151_v25 }
 0x1c4   :  { %v257_v30 = vpop.f32.mrf.mxu1 }
 0x1c5   :  { %v258_v31 = vadd.f32 %v399_v29, %v257_v30 }
 0x1c6   :  { %v464_v32 = vpop.f32.mrf.mxu1 }
 0x1c7   :  { %v263_v33 = vmax.f32 %v258_v31, 0.0 }
 0x1c8   :  { %v260_v34 = vpop.f32.mrf.mxu1 }
 0x1c9   :  { %v264_v35 = vpack.c.bf16 %v263_v33, %v263_v33 }
 0x1ca   :  { %v465_v36 = vpop.f32.mrf.mxu1 }
 0x1cb   :  { %483 = vmatmul.mubr.bf16.vlgmr.msra.gmra.mxu0 %v264_v35 }
 0x28b   :  { %v370_v38 = vpop.f32.mrf.mxu0 }
 0x28c   :  { %v371_v39 = vadd.f32 %v408_v37, %v370_v38 }
 0x28d   :  { %v484_v40 = vpop.f32.mrf.mxu0 }
 0x28e   :  { %513 = vtanh.f32 %v371_v39 }
 0x28f   :  { %v373_v41 = vpop.f32.mrf.mxu0 }
 0x291   :  { %v485_v42 = vpop.f32.mrf.mxu0 }
 0x29b   :  { %v514_v43 = vpop.eup %513 }
 0x29c   :  { %377 = vst [vmem:[#allocation10] sm:$0xff] %v514_v43 }
 0x29d   :  { %606 = shalt.err (!%p603_p10)
}
 0x29e   :  { %387 = dma.vmem_to_hbm [thread:$0]  %s385_s4, 128, %s736_s7, [#allocation4]  }
 0x29f   :  { %621 = dma.done.wait [#allocation4], 128  }
 0x2a0   :  { %622 = vsyncadd [#allocation4], 4294967168 }
 0x2a1   :  { %391 = vsyncpa [#allocation3], 1 }
 0x2a2   :  { %392 = vsyncpa [#allocation6], 1 }
 0x2a3   :  { %393 = vsyncpa [#allocation9], 1 }
 0x2a4   :  { %394 = vsyncpa [#allocation4], 1 }

</bundles_post_ra>
